<compile_context>
chip_gen: v7x
topology: tpu7x:2x2x1
jax: 0.10.0
libtpu: 0.0.40
codegen_flags: <defaults>
</compile_context>

<pallas_src>
import jax
import jax.numpy as jnp
from jax.experimental import pallas as pl
from jax.experimental.pallas import tpu as pltpu

_LANE = 128      # lane width of a vreg
_SUBLANE = 8     # sublane count of a vreg


def _round_up(x: int, m: int) -> int:
    return ((x + m - 1) // m) * m


def pack_params(weights, biases, wpad, param_dtype=jnp.float32):
    """Pack every layer into one (2 * n_layers * wpad, wpad) slab.

    Layer i occupies two wpad-row blocks:
      rows [2*i*wpad,       2*i*wpad + wpad)  : W_i stored as (out, in), zero-padded
      rows [2*i*wpad + wpad, 2*(i+1)*wpad)    : bias_i stored as a COLUMN at lane 0
    Column layout lets the kernel broadcast the bias along the lane (batch) axis.
    Returns (slab, ((w_off, b_off), ...)) with static row offsets.
    """
    n_layers = len(weights)
    rows_per_layer = 2 * wpad
    slab = jnp.zeros((n_layers * rows_per_layer, wpad), param_dtype)
    offsets = []
    for i, (w, b) in enumerate(zip(weights, biases)):
        fan_in, fan_out = int(w.shape[0]), int(w.shape[1])
        w_off = i * rows_per_layer
        b_off = w_off + wpad
        # weights are supplied as (in, out); store transposed -> (out, in).
        slab = slab.at[w_off:w_off + fan_out, :fan_in].set(
            w.T.astype(param_dtype))
        slab = slab.at[b_off:b_off + fan_out, 0].set(
            jnp.reshape(b, (-1,)).astype(param_dtype))
        offsets.append((w_off, b_off))
    return slab, tuple(offsets)


def _make_mlp_kernel(layer_meta, compute_dtype):
    """Kernel computing the full MLP for one batch tile (batch on lanes).

    layer_meta: tuple of (w_off, b_off, rows_out, cols_in) static ints.
    ReLU after every layer except the last (intermediate_af=ReLU, last_af=None).
    """
    n_layers = len(layer_meta)

    def kernel(x_ref, p_ref, o_ref):
        h = x_ref[...]                                   # (spad_in, tile_b) f32
        for i, (w_off, b_off, rows_out, cols_in) in enumerate(layer_meta):
            w = p_ref[pl.ds(w_off, rows_out), pl.ds(0, cols_in)]      # (out_pad, in_pad)
            b = p_ref[pl.ds(b_off, rows_out), pl.ds(0, 1)].astype(jnp.float32)  # (out_pad, 1)
            if h.dtype != compute_dtype:                 # bf16 MXU path (optional)
                h = h.astype(compute_dtype)
            # y = W @ h  (+ bias, f32) ; batch stays on the lane axis.
            h = jnp.dot(w, h, preferred_element_type=jnp.float32) + b
            if i < n_layers - 1:                         # intermediate_af = ReLU
                h = jnp.maximum(h, 0.0)
            # last_af = None -> no activation on the final layer
        o_ref[...] = h.astype(o_ref.dtype)               # (spad_out, tile_b), lane-dense

    return kernel


def state_action_value_forward(state, weights, biases, *,
                               param_dtype=jnp.float32, max_tile_b=1024):
    """Pallas forward pass.

    state:   (B, dim_states) float32
    weights: list of (in_features, out_features) arrays (PyTorch W transposed)
    biases:  list of (1, out_features) arrays
    returns: (B, n_actions) float32
    """
    batch, dim_states = int(state.shape[0]), int(state.shape[1])
    n_actions = int(weights[-1].shape[1])
    n_layers = len(weights)

    feature_dims = [dim_states] + [int(w.shape[1]) for w in weights]
    wpad = _round_up(max(feature_dims), _LANE)           # uniform padded width (=128 here)
    spad_in = _round_up(dim_states, _SUBLANE)            # compact input sublanes (=8)
    spad_out = _round_up(n_actions, _SUBLANE)            # compact output sublanes (=8)

    slab, offsets = pack_params(weights, biases, wpad, param_dtype)

    # Batch tile on the LANE axis: multiple of 128, at most max_tile_b, and
    # capped at ceil(batch/2) (rounded up) so large batches give grid >= 2 and
    # both v7x TensorCores get a shard via the "parallel" axis.
    half_cap = _round_up(max((batch + 1) // 2, 1), _LANE)
    tile_b = max(_LANE, (min(max_tile_b, half_cap) // _LANE) * _LANE)
    bp = _round_up(batch, tile_b)

    # Compact transposed input (spad_in, bp): ~2x the real state bytes (vs the
    # old 32x-inflated 128-lane pad). Zero padding keeps the math exact.
    x = jnp.pad(state.T.astype(jnp.float32),
                ((0, spad_in - dim_states), (0, bp - batch)))

    # Static per-layer shapes: layer 0 contracts over the compact input width,
    # the last layer only produces the compact output rows.
    layer_meta = []
    for i, (w_off, b_off) in enumerate(offsets):
        cols_in = spad_in if i == 0 else wpad
        rows_out = spad_out if i == n_layers - 1 else wpad
        layer_meta.append((w_off, b_off, rows_out, cols_in))
    layer_meta = tuple(layer_meta)

    flops = 2 * batch * sum(int(w.shape[0]) * int(w.shape[1]) for w in weights)
    bytes_accessed = (slab.size * slab.dtype.itemsize
                      + x.size * x.dtype.itemsize
                      + spad_out * bp * 4)
    cost = pl.CostEstimate(flops=flops, transcendentals=0,
                           bytes_accessed=bytes_accessed)

    out_t = pl.pallas_call(
        _make_mlp_kernel(layer_meta, param_dtype),
        out_shape=jax.ShapeDtypeStruct((spad_out, bp), jnp.float32),
        grid=(bp // tile_b,),
        in_specs=[
            # state: batch-tiled along lanes, compact 8 sublanes.
            pl.BlockSpec((spad_in, tile_b), lambda i: (0, i)),
            # params: whole slab, resident across the grid, single-buffered.
            pl.BlockSpec(slab.shape, lambda i: (0, 0),
                         pipeline_mode=pl.Buffered(buffer_count=1)),
        ],
        out_specs=pl.BlockSpec((spad_out, tile_b), lambda i: (0, i)),
        compiler_params=pltpu.CompilerParams(
            dimension_semantics=("parallel",)),          # v7x: split batch across TCs
        cost_estimate=cost,
    )(x, slab)

    # Compact slice + transpose back to (B, n_actions); tiny vs the old 64x-wide slice.
    return out_t[:n_actions, :batch].T


def init_params(key, dim_states, hidden_layer_sizes, n_actions):
    """Deterministic init mirroring nn.Linear's default U(-1/sqrt(fan_in), ·)."""
    layer_defs = [dim_states] + list(hidden_layer_sizes) + [n_actions]
    weights, biases = [], []
    for i in range(len(layer_defs) - 1):
        fan_in, fan_out = layer_defs[i], layer_defs[i + 1]
        key, wk, bk = jax.random.split(key, 3)
        bound = 1.0 / jnp.sqrt(fan_in)
        # Stored as (in, out): transposed relative to PyTorch's (out, in) layout.
        w = jax.random.uniform(wk, (fan_in, fan_out), jnp.float32, -bound, bound)
        b = jax.random.uniform(bk, (1, fan_out), jnp.float32, -bound, bound)
        weights.append(w)
        biases.append(b)
    return weights, biases


def reference_forward(state, weights, biases):
    """Pure-JAX reference of StateActionValueNetwork.forward."""
    h = state
    n = len(weights)
    for i, (w, b) in enumerate(zip(weights, biases)):
        h = h @ w + b
        if i < n - 1:
            h = jnp.maximum(h, 0.0)
    return h


if __name__ == "__main__":
    # Shapes consistent with the module's constructor:
    # dim_states=4, hidden_layer_sizes=[32, 32], n_actions=2.
    dim_states = 4
    hidden_layer_sizes = [32, 32]
    n_actions = 2

    key = jax.random.PRNGKey(0)
    key, pkey = jax.random.split(key)
    weights, biases = init_params(pkey, dim_states, hidden_layer_sizes, n_actions)

    # Small batch (single grid step, full lane padding exercised).
    key, skey = jax.random.split(key)
    state_small = jax.random.normal(skey, (8, dim_states), jnp.float32)
    out_small = jax.block_until_ready(
        state_action_value_forward(state_small, weights, biases))
    ref_small = reference_forward(state_small, weights, biases)
    assert out_small.shape == (8, n_actions)
    assert jnp.allclose(out_small, ref_small, atol=1e-5, rtol=1e-5), \
        "Pallas output mismatch vs reference (small batch)"

    # Larger, non-multiple batch exercising the multi-step 'parallel' grid,
    # lane padding of the batch, and the resident single-buffered slab.
    key, skey = jax.random.split(key)
    state_big = jax.random.normal(skey, (300, dim_states), jnp.float32)
    out_big = jax.block_until_ready(
        state_action_value_forward(state_big, weights, biases))
    ref_big = reference_forward(state_big, weights, biases)
    assert out_big.shape == (300, n_actions)
    assert jnp.allclose(out_big, ref_big, atol=1e-5, rtol=1e-5), \
        "Pallas output mismatch vs reference (batched grid)"

    print("KERNEL_OK")
</pallas_src>

<mosaic_0001>
module attributes {stable_mosaic.version = 11 : i64} {
  func.func @kernel(%arg0: i32, %arg1: memref<8x128xf32, #tpu.memory_space<vmem>>, %arg2: memref<768x128xf32, #tpu.memory_space<vmem>>, %arg3: memref<8x128xf32, #tpu.memory_space<vmem>>) attributes {dimension_semantics = [#tpu.dimension_semantics<parallel>], iteration_bounds = array<i64: 1>, scalar_prefetch = 0 : i64, scratch_operands = 0 : i64, tpu.core_type = #tpu.core_type<tc>, window_params = [{transform_indices = @transform_0, window_bounds = array<i64: 8, 128>}, {pipeline_mode = #tpu.pipeline_mode<synchronous>, transform_indices = @transform_1, window_bounds = array<i64: 768, 128>}, {transform_indices = @transform_2, window_bounds = array<i64: 8, 128>}]} {
    %c0 = arith.constant 0 : index
    %c0_0 = arith.constant 0 : index
    %0 = vector.load %arg1[%c0, %c0_0] : memref<8x128xf32, #tpu.memory_space<vmem>>, vector<8x128xf32>
    %c0_1 = arith.constant 0 : index
    %c0_2 = arith.constant 0 : index
    %1 = vector.load %arg2[%c0_1, %c0_2] : memref<768x128xf32, #tpu.memory_space<vmem>>, vector<128x8xf32>
    %c128 = arith.constant 128 : index
    %c0_3 = arith.constant 0 : index
    %2 = vector.load %arg2[%c128, %c0_3] : memref<768x128xf32, #tpu.memory_space<vmem>>, vector<128x1xf32>
    %cst = arith.constant dense<0.000000e+00> : vector<128x128xf32>
    %3 = tpu.matmul %1, %0, %cst {dimension_numbers = #tpu.dot_dimension_numbers<[1], [0], [0], [1], [0, 0, 1, 1], [], []>} : vector<128x8xf32>, vector<8x128xf32>, vector<128x128xf32> -> vector<128x128xf32>
    %4 = vector.broadcast %2 : vector<128x1xf32> to vector<128x128xf32>
    %5 = arith.addf %3, %4 : vector<128x128xf32>
    %cst_4 = arith.constant 0.000000e+00 : f32
    %6 = vector.broadcast %cst_4 : f32 to vector<128x128xf32>
    %7 = arith.maximumf %5, %6 : vector<128x128xf32>
    %c256 = arith.constant 256 : index
    %c0_5 = arith.constant 0 : index
    %8 = vector.load %arg2[%c256, %c0_5] : memref<768x128xf32, #tpu.memory_space<vmem>>, vector<128x128xf32>
    %c384 = arith.constant 384 : index
    %c0_6 = arith.constant 0 : index
    %9 = vector.load %arg2[%c384, %c0_6] : memref<768x128xf32, #tpu.memory_space<vmem>>, vector<128x1xf32>
    %cst_7 = arith.constant dense<0.000000e+00> : vector<128x128xf32>
    %10 = tpu.matmul %8, %7, %cst_7 {dimension_numbers = #tpu.dot_dimension_numbers<[1], [0], [0], [1], [0, 0, 1, 1], [], []>} : vector<128x128xf32>, vector<128x128xf32>, vector<128x128xf32> -> vector<128x128xf32>
    %11 = vector.broadcast %9 : vector<128x1xf32> to vector<128x128xf32>
    %12 = arith.addf %10, %11 : vector<128x128xf32>
    %cst_8 = arith.constant 0.000000e+00 : f32
    %13 = vector.broadcast %cst_8 : f32 to vector<128x128xf32>
    %14 = arith.maximumf %12, %13 : vector<128x128xf32>
    %c512 = arith.constant 512 : index
    %c0_9 = arith.constant 0 : index
    %15 = vector.load %arg2[%c512, %c0_9] : memref<768x128xf32, #tpu.memory_space<vmem>>, vector<8x128xf32>
    %c640 = arith.constant 640 : index
    %c0_10 = arith.constant 0 : index
    %16 = vector.load %arg2[%c640, %c0_10] : memref<768x128xf32, #tpu.memory_space<vmem>>, vector<8x1xf32>
    %cst_11 = arith.constant dense<0.000000e+00> : vector<8x128xf32>
    %17 = tpu.matmul %15, %14, %cst_11 {dimension_numbers = #tpu.dot_dimension_numbers<[1], [0], [0], [1], [0, 0, 1, 1], [], []>} : vector<8x128xf32>, vector<128x128xf32>, vector<8x128xf32> -> vector<8x128xf32>
    %18 = vector.broadcast %16 : vector<8x1xf32> to vector<8x128xf32>
    %19 = arith.addf %17, %18 : vector<8x128xf32>
    %c0_12 = arith.constant 0 : index
    %c0_13 = arith.constant 0 : index
    %20 = vector.load %arg3[%c0_12, %c0_13] : memref<8x128xf32, #tpu.memory_space<vmem>>, vector<8x128xf32>
    tpu.vector_store %arg3[%c0_12, %c0_13], %19 {strides = array<i32>} : memref<8x128xf32, #tpu.memory_space<vmem>>, vector<8x128xf32>,
    return
  }
  func.func @transform_0(%arg0: i32) -> (i32, i32) {
    %c0_i32 = arith.constant 0 : i32
    %c0_i32_0 = arith.constant 0 : i32
    return %c0_i32, %arg0 : i32, i32
  }
  func.func @transform_1(%arg0: i32) -> (i32, i32) {
    %c0_i32 = arith.constant 0 : i32
    %c0_i32_0 = arith.constant 0 : i32
    %c0_i32_1 = arith.constant 0 : i32
    return %c0_i32, %c0_i32_0 : i32, i32
  }
  func.func @transform_2(%arg0: i32) -> (i32, i32) {
    %c0_i32 = arith.constant 0 : i32
    %c0_i32_0 = arith.constant 0 : i32
    return %c0_i32, %arg0 : i32, i32
  }
}

</mosaic_0001>

<bundles_post_ra>
// kernel: tpu_custom_call.1
= control target key start
LH: loop header
LB: loop body
LE: loop exit
PB: predicated region body
PF: predicated region fallthrough
CT: control target
= control target key end

     0   :  { %7 = vsyncpa [#allocation3], 0  ;;  %s1157_s0 = inlined_call_operand.hbm [shape: f32[8,128], index: 0, kind: input, shape index: {}]   ;;  %s1158_s1 = inlined_call_operand.hbm [shape: f32[768,128], index: 1, kind: input, shape index: {}]   ;;  %s1159_s2 = inlined_call_operand.hbm [shape: f32[8,128], index: 2, kind: output, shape index: {}]  }
   0x1   :  { %8 = vsyncpa [#allocation6], 0 }
   0x2   :  { %9 = vsyncpa [#allocation4], 0  ;;  %s1066_s9 = smov [#allocation2]   ;;  %s1067_s11 = smov [#allocation5]  }
   0x3   :  { %s16_s10 = sshll.u32 %s1066_s9, 4  ;;  %s25_s12 = sshll.u32 %s1067_s11, 4  ;;  %s17_s10 = int_to_ptr.vmem [resolvable:$true] %s16_s10  ;;  %s1090_s12 = int_to_ptr.vmem [resolvable:$true] %s25_s12 }
   0x4   :  { %s994_s15 = scalar_lea.hbm %s1157_s0, 128 }
   0x5   :  { %p995_p0 = scmp.ne.s32.totalorder %s1157_s0, %s994_s15  ;;  %p998_p1 = scmp.lt.u32.totalorder %s994_s15, %s1157_s0 }
   0x7   :  { %p1000_p2 = pnand %p998_p1, %p995_p0 }
   0x9   :  { %1003 = shalt.err (!%p1000_p2)
}
   0xa   :  { %s1004_s20 = scalar_lea.vmem %s17_s10, 128  ;;  %p1009_p4 = scmp.lt.s32.totalorder %s17_s10, %s17_s10 }
   0xb   :  { %p1005_p3 = scmp.ne.s32.totalorder %s17_s10, %s1004_s20  ;;  %p1010_p5 = scmp.lt.s32.totalorder %s1004_s20, %s1004_s20 }
   0xd   :  { %p1011_p6 = por %p1010_p5, %p1009_p4 }
   0xf   :  { %p1012_p7 = pnand %p1011_p6, %p1005_p3 }
  0x11   :  { %1015 = shalt.err (!%p1012_p7)
}
  0x12   :  { %19 = dma.hbm_to_vmem [thread:$0]  %s1157_s0, 128, %s17_s10, [#allocation3]  }
  0x13   :  { %s1016_s25 = scalar_lea.hbm %s1158_s1, 12288 }
  0x14   :  { %p1017_p8 = scmp.ne.s32.totalorder %s1158_s1, %s1016_s25  ;;  %p1020_p9 = scmp.lt.u32.totalorder %s1016_s25, %s1158_s1 }
  0x16   :  { %p1022_p10 = pnand %p1020_p9, %p1017_p8 }
  0x18   :  { %1025 = shalt.err (!%p1022_p10)
}
  0x19   :  { %s1026_s30 = scalar_lea.vmem %s1090_s12, 12288  ;;  %p1031_p12 = scmp.lt.s32.totalorder %s1090_s12, %s1090_s12 }
  0x1a   :  { %p1027_p11 = scmp.ne.s32.totalorder %s1090_s12, %s1026_s30  ;;  %p1032_p13 = scmp.lt.s32.totalorder %s1026_s30, %s1026_s30 }
  0x1c   :  { %p1033_p0 = por %p1032_p13, %p1031_p12 }
  0x1e   :  { %p1034_p1 = pnand %p1033_p0, %p1027_p11 }
  0x20   :  { %1037 = shalt.err (!%p1034_p1)
}
  0x21   :  { %s1068_s0 = smov 128   ;;  %s1069_s3 = smov 8  }
  0x22   :  { %31 = dma.hbm_to_vmem [thread:$0]  %s1158_s1, 12288, %s1090_s12, [#allocation6], %s1068_s0, %s1068_s0, %s1069_s3  }
  0x23   :  { %1060 = dma.done.wait [#allocation3], 128  }
  0x24   :  { %1061 = vsyncadd [#allocation3], 4294967168 }
  0x25   :  { %1062 = dma.done.wait [#allocation6], 12288  }
  0x26   :  { %1063 = vsyncadd [#allocation6], 4294955008  ;;  %v1070_v0 = vmov 0   ;;  %vm151_vm0 = vcmask 64512   ;;  %v38_v1 = vld [vmem:[#allocation2] sm:$0xff]  ;;  %v39_v2 = vld [vmem:[#allocation5] sm:$0xff] }
  0x27   :  { %992 = vset.pattern.permute.xlu0 %v1070_v0  ;;  %993 = vset.pattern.permute.xlu1 %v1070_v0  ;;  %v40_v3 = vld [vmem:[#allocation5 + $0x8] sm:$0xff]  ;;  %v41_v4 = vld [vmem:[#allocation5 + $0x10] sm:$0xff]  ;;  %v55_v5 = vld [vmem:[#allocation5 + $0x80] sm:$0xff]  ;;  %vm1072_vm1 = vmmov 0   ;;  %s1074_s1 = smov [#allocation7]  }
  0x28   :  { %810 = vmatprep.subr.mxu0 %v38_v1  ;;  %812 = vmatprep.mubr.msk.f32.mxu0 %vm151_vm0, %v39_v2  ;;  %v42_v6 = vld [vmem:[#allocation5 + $0x18] sm:$0xff]  ;;  %v43_v7 = vld [vmem:[#allocation5 + $0x20] sm:$0xff]  ;;  %v56_v8 = vld [vmem:[#allocation5 + $0x88] sm:$0xff]  ;;  %s718_s6 = sshll.u32 %s1074_s1, 4  ;;  %s719_s6 = int_to_ptr.vmem [resolvable:$true] %s718_s6 }
  0x29   :  { %811 = vmatpush3.msra.mxu0 %v38_v1  ;;  %73 = vperm.xlu0 %992, %v55_v5   ;;  %v57_v9 = vld [vmem:[#allocation5 + $0x90] sm:$0xff]  ;;  %v58_v10 = vld [vmem:[#allocation5 + $0x98] sm:$0xff]  ;;  %v44_v11 = vld [vmem:[#allocation5 + $0x28] sm:$0xff]  ;;  %s1038_s7 = scalar_lea.vmem %s719_s6, 128  ;;  %p1043_p3 = scmp.lt.s32.totalorder %s719_s6, %s719_s6 }
  0x2a   :  { %813 = vmatmul.mubr.msk.f32.vlgmr.msra.gmra.mrb[0].mxu0 %vm151_vm0, %v40_v3  ;;  %83 = vperm.xlu1 %993, %v57_v9   ;;  %v45_v12 = vld [vmem:[#allocation5 + $0x30] sm:$0xff]  ;;  %v59_v13 = vld [vmem:[#allocation5 + $0xa0] sm:$0xff]  ;;  %v60_v14 = vld [vmem:[#allocation5 + $0xa8] sm:$0xff]  ;;  %p1039_p2 = scmp.ne.s32.totalorder %s719_s6, %s1038_s7  ;;  %p1044_p4 = scmp.lt.s32.totalorder %s1038_s7, %s1038_s7 }
  0x2b   :  { %815 = vmatprep.mubr.msk.f32.mxu0 %vm151_vm0, %v41_v4  ;;  %v46_v15 = vld [vmem:[#allocation5 + $0x38] sm:$0xff]  ;;  %v47_v16 = vld [vmem:[#allocation5 + $0x40] sm:$0xff]  ;;  %v61_v17 = vld [vmem:[#allocation5 + $0xb0] sm:$0xff] }
  0x2c   :  { %v62_v18 = vld [vmem:[#allocation5 + $0xb8] sm:$0xff]  ;;  %v48_v19 = vld [vmem:[#allocation5 + $0x48] sm:$0xff]  ;;  %v49_v20 = vld [vmem:[#allocation5 + $0x50] sm:$0xff]  ;;  %p1045_p5 = por %p1044_p4, %p1043_p3 }
  0x2d   :  { %78 = vperm.xlu0 %992, %v56_v8   ;;  %v63_v21 = vld [vmem:[#allocation5 + $0xc0] sm:$0xff]  ;;  %v64_v22 = vld [vmem:[#allocation5 + $0xc8] sm:$0xff]  ;;  %v50_v23 = vld [vmem:[#allocation5 + $0x58] sm:$0xff] }
  0x2e   :  { %816 = vmatmul.mubr.msk.f32.gmra.mrb[2].mxu0 %vm151_vm0, %v42_v6  ;;  %88 = vperm.xlu1 %993, %v58_v10   ;;  %v51_v24 = vld [vmem:[#allocation5 + $0x60] sm:$0xff]  ;;  %v65_v25 = vld [vmem:[#allocation5 + $0xd0] sm:$0xff]  ;;  %v66_v26 = vld [vmem:[#allocation5 + $0xd8] sm:$0xff]  ;;  %p1046_p6 = pnand %p1045_p5, %p1039_p2 }
  0x2f   :  { %818 = vmatprep.mubr.msk.f32.mxu0 %vm151_vm0, %v43_v7  ;;  %v52_v27 = vld [vmem:[#allocation5 + $0x68] sm:$0xff]  ;;  %v53_v28 = vld [vmem:[#allocation5 + $0x70] sm:$0xff]  ;;  %v67_v29 = vld [vmem:[#allocation5 + $0xe0] sm:$0xff] }
  0x30   :  { %v68_v30 = vld [vmem:[#allocation5 + $0xe8] sm:$0xff]  ;;  %v54_v31 = vld [vmem:[#allocation5 + $0x78] sm:$0xff]  ;;  %v69_v32 = vld [vmem:[#allocation5 + $0xf0] sm:$0xff] }
  0x31   :  { %93 = vperm.xlu0 %992, %v59_v13   ;;  %v70_v33 = vld [vmem:[#allocation5 + $0xf8] sm:$0xff]  ;;  %v377_v34 = vld [vmem:[#allocation5 + $0x180] sm:$0xff]  ;;  %v378_v35 = vld [vmem:[#allocation5 + $0x188] sm:$0xff] }
  0x32   :  { %819 = vmatmul.mubr.msk.f32.gmra.mrb[4].mxu0 %vm151_vm0, %v44_v11  ;;  %98 = vperm.xlu1 %993, %v60_v14   ;;  %v379_v36 = vld [vmem:[#allocation5 + $0x190] sm:$0xff]  ;;  %v380_v37 = vld [vmem:[#allocation5 + $0x198] sm:$0xff]  ;;  %v381_v38 = vld [vmem:[#allocation5 + $0x1a0] sm:$0xff] }
  0x33   :  { %821 = vmatprep.mubr.msk.f32.mxu0 %vm151_vm0, %v45_v12  ;;  %v382_v39 = vld [vmem:[#allocation5 + $0x1a8] sm:$0xff]  ;;  %v383_v40 = vld [vmem:[#allocation5 + $0x1b0] sm:$0xff]  ;;  %v384_v41 = vld [vmem:[#allocation5 + $0x1b8] sm:$0xff] }
  0x34   :  { %v385_v42 = vld [vmem:[#allocation5 + $0x1c0] sm:$0xff]  ;;  %v386_v43 = vld [vmem:[#allocation5 + $0x1c8] sm:$0xff]  ;;  %v387_v44 = vld [vmem:[#allocation5 + $0x1d0] sm:$0xff] }
  0x35   :  { %103 = vperm.xlu0 %992, %v61_v17   ;;  %v388_v45 = vld [vmem:[#allocation5 + $0x1d8] sm:$0xff]  ;;  %v389_v46 = vld [vmem:[#allocation5 + $0x1e0] sm:$0xff]  ;;  %v390_v47 = vld [vmem:[#allocation5 + $0x1e8] sm:$0xff] }
  0x36   :  { %822 = vmatmul.mubr.msk.f32.gmra.mrb[6].mxu0 %vm151_vm0, %v46_v15  ;;  %108 = vperm.xlu1 %993, %v62_v18   ;;  %v391_v48 = vld [vmem:[#allocation5 + $0x1f0] sm:$0xff]  ;;  %v392_v49 = vld [vmem:[#allocation5 + $0x1f8] sm:$0xff]  ;;  %v635_v50 = vld [vmem:[#allocation5 + $0x280] sm:$0xff] }
  0x37   :  { %824 = vmatprep.mubr.msk.f32.mxu0 %vm151_vm0, %v47_v16  ;;  %v361_v51 = vld [vmem:[#allocation5 + $0x100] sm:$0xff] }
  0x38   :  { %868 = vmatprep.mubr.f32.mxu1 %v361_v51 }
  0x39   :  { %113 = vperm.xlu0 %992, %v63_v21  }
  0x3a   :  { %825 = vmatmul.mubr.msk.f32.gmra.mrb[8].mxu0 %vm151_vm0, %v48_v19  ;;  %118 = vperm.xlu1 %993, %v64_v22  }
  0x3b   :  { %827 = vmatprep.mubr.msk.f32.mxu0 %vm151_vm0, %v49_v20 }
  0x3d   :  { %123 = vperm.xlu0 %992, %v65_v25  }
  0x3e   :  { %828 = vmatmul.mubr.msk.f32.gmra.mrb[10].mxu0 %vm151_vm0, %v50_v23  ;;  %128 = vperm.xlu1 %993, %v66_v26  }
  0x3f   :  { %830 = vmatprep.mubr.msk.f32.mxu0 %vm151_vm0, %v51_v24 }
  0x41   :  { %133 = vperm.xlu0 %992, %v67_v29  }
  0x42   :  { %831 = vmatmul.mubr.msk.f32.gmra.mrb[12].mxu0 %vm151_vm0, %v52_v27  ;;  %138 = vperm.xlu1 %993, %v68_v30  }
  0x43   :  { %833 = vmatprep.mubr.msk.f32.mxu0 %vm151_vm0, %v53_v28 }
  0x45   :  { %143 = vperm.xlu0 %992, %v69_v32  }
  0x46   :  { %834 = vmatmul.mubr.msk.f32.gmra.mrb[14].mxu0 %vm151_vm0, %v54_v31  ;;  %148 = vperm.xlu1 %993, %v70_v33  }
  0x49   :  { %395 = vperm.xlu0 %992, %v377_v34  }
  0x4a   :  { %400 = vperm.xlu1 %993, %v378_v35  }
  0x4d   :  { %405 = vperm.xlu0 %992, %v379_v36  }
  0x4e   :  { %410 = vperm.xlu1 %993, %v380_v37  }
  0x51   :  { %415 = vperm.xlu0 %992, %v381_v38  }
  0x52   :  { %420 = vperm.xlu1 %993, %v382_v39  }
  0x55   :  { %425 = vperm.xlu0 %992, %v383_v40  }
  0x56   :  { %430 = vperm.xlu1 %993, %v384_v41  }
  0x59   :  { %435 = vperm.xlu0 %992, %v385_v42  }
  0x5a   :  { %440 = vperm.xlu1 %993, %v386_v43  }
  0x5d   :  { %445 = vperm.xlu0 %992, %v387_v44  }
  0x5e   :  { %450 = vperm.xlu1 %993, %v388_v45  }
  0x61   :  { %455 = vperm.xlu0 %992, %v389_v46  }
  0x62   :  { %460 = vperm.xlu1 %993, %v390_v47  }
  0x65   :  { %465 = vperm.xlu0 %992, %v391_v48  }
  0x66   :  { %470 = vperm.xlu1 %993, %v392_v49  }
  0x69   :  { %638 = vperm.xlu0 %992, %v635_v50  }
  0xa8   :  { %v74_v53 = vpop.permute.xlu0 %73 }
  0xa9   :  { %v84_v52 = vpop.permute.xlu1 %83 }
  0xac   :  { %v79_v55 = vpop.permute.xlu0 %78 }
  0xad   :  { %v89_v54 = vpop.permute.xlu1 %88 }
  0xb0   :  { %v94_v57 = vpop.permute.xlu0 %93 }
  0xb1   :  { %v99_v56 = vpop.permute.xlu1 %98 }
  0xb4   :  { %v104_v2 = vpop.permute.xlu0 %103 }
  0xb5   :  { %v109_v63 = vpop.permute.xlu1 %108 }
  0xb8   :  { %v114_v15 = vpop.permute.xlu0 %113 }
  0xb9   :  { %v119_v12 = vpop.permute.xlu1 %118 }
  0xbc   :  { %v124_v27 = vpop.permute.xlu0 %123 }
  0xbd   :  { %v129_v24 = vpop.permute.xlu1 %128 }
  0xc0   :  { %v134_v40 = vpop.permute.xlu0 %133 }
  0xc1   :  { %v139_v37 = vpop.permute.xlu1 %138 }
  0xc5   :  { %v149_v49 = vpop.permute.xlu1 %148 }
  0xfd   :  { %v814_v58 = vpop.f32.mrb[0].mxu0 }
  0xfe   :  { %v272_v59 = vadd.f32 %v814_v58, %v79_v55  ;;  %v266_v60 = vpop.f32.mrb[1].mxu0 }
  0xff   :  { %v267_v61 = vadd.f32 %v266_v60, %v74_v53  ;;  %v362_v60 = vld [vmem:[#allocation5 + $0x108] sm:$0xff] }
 0x100   :  { %v346_v62 = vmax.f32 %v272_v59, 0.0 }
 0x101   :  { %v345_v0 = vmax.f32 %v267_v61, 0.0  ;;  %v817_v1 = vpop.f32.mrb[2].mxu0  ;;  %v363_v61 = vld [vmem:[#allocation5 + $0x110] sm:$0xff] }
 0x102   :  { %v282_v3 = vadd.f32 %v817_v1, %v89_v54  ;;  %v276_v4 = vpop.f32.mrb[3].mxu0  ;;  %v367_v1 = vld [vmem:[#allocation5 + $0x130] sm:$0xff] }
 0x103   :  { %v277_v5 = vadd.f32 %v276_v4, %v84_v52  ;;  %v927_v6 = vpack.c.bf16 %v346_v62, %v345_v0  ;;  %v144_v52 = vpop.permute.xlu0 %143  ;;  %v364_v62 = vld [vmem:[#allocation5 + $0x118] sm:$0xff]  ;;  %v366_v0 = vld [vmem:[#allocation5 + $0x128] sm:$0xff] }
 0x104   :  { %v348_v7 = vmax.f32 %v282_v3, 0.0  ;;  %v369_v3 = vld [vmem:[#allocation5 + $0x140] sm:$0xff]  ;;  %v370_v4 = vld [vmem:[#allocation5 + $0x148] sm:$0xff] }
 0x105   :  { %v347_v8 = vmax.f32 %v277_v5, 0.0  ;;  %v820_v9 = vpop.f32.mrb[4].mxu0  ;;  %928 = vmatprep.subr.bf16.mxu1 %v927_v6  ;;  %v371_v5 = vld [vmem:[#allocation5 + $0x150] sm:$0xff] }
 0x106   :  { %v292_v10 = vadd.f32 %v820_v9, %v99_v56  ;;  %v286_v11 = vpop.f32.mrb[5].mxu0  ;;  %930 = vmatpush3.bf16.msra.mxu1 %v927_v6  ;;  %v372_v6 = vld [vmem:[#allocation5 + $0x158] sm:$0xff]  ;;  %v375_v9 = vld [vmem:[#allocation5 + $0x170] sm:$0xff] }
 0x107   :  { %v931_v13 = vpack.c.bf16 %v348_v7, %v347_v8  ;;  %v287_v14 = vadd.f32 %v286_v11, %v94_v57  ;;  %v373_v7 = vld [vmem:[#allocation5 + $0x160] sm:$0xff]  ;;  %v374_v8 = vld [vmem:[#allocation5 + $0x168] sm:$0xff]  ;;  %v1071_v11 = vmov 0.0|0.0  }
 0x108   :  { %v350_v16 = vmax.f32 %v292_v10, 0.0  ;;  %v376_v10 = vld [vmem:[#allocation5 + $0x178] sm:$0xff]  ;;  %959 = vmatprep.subr.bf16.mxu0 %v1071_v11 }
 0x109   :  { %v349_v17 = vmax.f32 %v287_v14, 0.0  ;;  %v823_v18 = vpop.f32.mrb[6].mxu0  ;;  %932 = vmatprep.subr.bf16.mxu1 %v931_v13  ;;  %v396_v14 = vpop.permute.xlu0 %395 }
 0x10a   :  { %v302_v19 = vadd.f32 %v823_v18, %v109_v63  ;;  %v296_v20 = vpop.f32.mrb[7].mxu0  ;;  %934 = vmatpush3.bf16.msra.mxu1 %v931_v13  ;;  %v365_v63 = vld [vmem:[#allocation5 + $0x120] sm:$0xff]  ;;  %v401_v13 = vpop.permute.xlu1 %400 }
 0x10b   :  { %v935_v21 = vpack.c.bf16 %v350_v16, %v349_v17  ;;  %v297_v22 = vadd.f32 %v296_v20, %v104_v2  ;;  %v368_v2 = vld [vmem:[#allocation5 + $0x138] sm:$0xff] }
 0x10c   :  { %v352_v23 = vmax.f32 %v302_v19, 0.0 }
 0x10d   :  { %v351_v25 = vmax.f32 %v297_v22, 0.0  ;;  %v826_v26 = vpop.f32.mrb[8].mxu0  ;;  %936 = vmatprep.subr.bf16.mxu1 %v935_v21  ;;  %v406_v16 = vpop.permute.xlu0 %405 }
 0x10e   :  { %v312_v28 = vadd.f32 %v826_v26, %v119_v12  ;;  %v306_v29 = vpop.f32.mrb[9].mxu0  ;;  %938 = vmatpush3.bf16.msra.mxu1 %v935_v21  ;;  %v1073_v12 = vmov 0.0  }
 0x10f   :  { %v939_v30 = vpack.c.bf16 %v352_v23, %v351_v25  ;;  %v307_v31 = vadd.f32 %v306_v29, %v114_v15  ;;  %924 = vmatprep.mubr.msk.f32.mxu0 %vm1072_vm1, %v1073_v12  ;;  %v411_v15 = vpop.permute.xlu1 %410 }
 0x110   :  { %v354_v32 = vmax.f32 %v312_v28, 0.0 }
 0x111   :  { %v353_v33 = vmax.f32 %v307_v31, 0.0  ;;  %v829_v34 = vpop.f32.mrb[10].mxu0  ;;  %940 = vmatprep.subr.bf16.mxu1 %v939_v30  ;;  %v416_v18 = vpop.permute.xlu0 %415 }
 0x112   :  { %v322_v35 = vadd.f32 %v829_v34, %v129_v24  ;;  %v316_v36 = vpop.f32.mrb[11].mxu0  ;;  %942 = vmatpush3.bf16.msra.mxu1 %v939_v30 }
 0x113   :  { %v943_v38 = vpack.c.bf16 %v354_v32, %v353_v33  ;;  %v317_v39 = vadd.f32 %v316_v36, %v124_v27  ;;  %v421_v17 = vpop.permute.xlu1 %420 }
 0x114   :  { %v356_v41 = vmax.f32 %v322_v35, 0.0 }
 0x115   :  { %v355_v42 = vmax.f32 %v317_v39, 0.0  ;;  %v832_v43 = vpop.f32.mrb[12].mxu0  ;;  %944 = vmatprep.subr.bf16.mxu1 %v943_v38  ;;  %v426_v27 = vpop.permute.xlu0 %425 }
 0x116   :  { %v332_v44 = vadd.f32 %v832_v43, %v139_v37  ;;  %v326_v45 = vpop.f32.mrb[13].mxu0  ;;  %946 = vmatpush3.bf16.msra.mxu1 %v943_v38 }
 0x117   :  { %v947_v46 = vpack.c.bf16 %v356_v41, %v355_v42  ;;  %v327_v47 = vadd.f32 %v326_v45, %v134_v40  ;;  %v431_v24 = vpop.permute.xlu1 %430 }
 0x118   :  { %v358_v48 = vmax.f32 %v332_v44, 0.0 }
 0x119   :  { %v357_v50 = vmax.f32 %v327_v47, 0.0  ;;  %v835_v51 = vpop.f32.mrb[14].mxu0  ;;  %948 = vmatprep.subr.bf16.mxu1 %v947_v46  ;;  %v436_v40 = vpop.permute.xlu0 %435 }
 0x11a   :  { %v342_v53 = vadd.f32 %v835_v51, %v149_v49  ;;  %v336_v54 = vpop.f32.mrb[15].mxu0  ;;  %950 = vmatpush3.bf16.msra.mxu1 %v947_v46 }
 0x11b   :  { %v951_v55 = vpack.c.bf16 %v358_v48, %v357_v50  ;;  %v337_v56 = vadd.f32 %v336_v54, %v144_v52  ;;  %v441_v37 = vpop.permute.xlu1 %440 }
 0x11c   :  { %v360_v57 = vmax.f32 %v342_v53, 0.0 }
 0x11d   :  { %v359_v58 = vmax.f32 %v337_v56, 0.0  ;;  %952 = vmatprep.subr.bf16.mxu1 %v951_v55  ;;  %v446_v52 = vpop.permute.xlu0 %445 }
 0x11e   :  { %954 = vmatpush3.bf16.msra.mxu1 %v951_v55 }
 0x11f   :  { %v955_v59 = vpack.c.bf16 %v360_v57, %v359_v58  ;;  %v451_v49 = vpop.permute.xlu1 %450 }
 0x121   :  { %956 = vmatprep.subr.bf16.mxu1 %v955_v59 }
 0x122   :  { %958 = vmatpush3.bf16.msra.mxu1 %v955_v59 }
 0x125   :  { %869 = vmatmul.mubr.f32.vlgmr.msra.gmra.mrb[0].mxu1 %v362_v60 }
 0x126   :  { %871 = vmatprep.mubr.f32.mxu1 %v363_v61 }
 0x129   :  { %872 = vmatmul.mubr.f32.gmra.mrb[2].mxu1 %v364_v62  ;;  %v461_v62 = vpop.permute.xlu1 %460 }
 0x12a   :  { %874 = vmatprep.mubr.f32.mxu1 %v365_v63 }
 0x12d   :  { %875 = vmatmul.mubr.f32.gmra.mrb[4].mxu1 %v366_v0 }
 0x12e   :  { %877 = vmatprep.mubr.f32.mxu1 %v367_v1  ;;  %v456_v1 = vpop.permute.xlu0 %455 }
 0x131   :  { %878 = vmatmul.mubr.f32.gmra.mrb[6].mxu1 %v368_v2 }
 0x132   :  { %880 = vmatprep.mubr.f32.mxu1 %v369_v3 }
 0x135   :  { %881 = vmatmul.mubr.f32.gmra.mrb[8].mxu1 %v370_v4 }
 0x136   :  { %883 = vmatprep.mubr.f32.mxu1 %v371_v5 }
 0x139   :  { %884 = vmatmul.mubr.f32.gmra.mrb[10].mxu1 %v372_v6 }
 0x13a   :  { %886 = vmatprep.mubr.f32.mxu1 %v373_v7 }
 0x13d   :  { %887 = vmatmul.mubr.f32.gmra.mrb[12].mxu1 %v374_v8 }
 0x13e   :  { %889 = vmatprep.mubr.f32.mxu1 %v375_v9 }
 0x141   :  { %890 = vmatmul.mubr.f32.gmra.mrb[14].mxu1 %v376_v10  ;;  %v471_v10 = vpop.permute.xlu1 %470 }
 0x1f8   :  { %v870_v19 = vpop.f32.mrb[0].mxu1 }
 0x1f9   :  { %v545_v20 = vadd.f32 %v870_v19, %v401_v13  ;;  %v539_v21 = vpop.f32.mrb[1].mxu1 }
 0x1fa   :  { %v540_v22 = vadd.f32 %v539_v21, %v396_v14  ;;  %v466_v14 = vpop.permute.xlu0 %465 }
 0x1fb   :  { %v619_v23 = vmax.f32 %v545_v20, 0.0 }
 0x1fc   :  { %v618_v25 = vmax.f32 %v540_v22, 0.0  ;;  %v873_v26 = vpop.f32.mrb[2].mxu1  ;;  %v634_v22 = vld [vmem:[#allocation5 + $0x200] sm:$0xff] }
 0x1fd   :  { %v555_v28 = vadd.f32 %v873_v26, %v411_v15  ;;  %v549_v29 = vpop.f32.mrb[3].mxu1 }
 0x1fe   :  { %v960_v30 = vpack.c.bf16 %v619_v23, %v618_v25  ;;  %v550_v31 = vadd.f32 %v549_v29, %v406_v16  ;;  %v639_v23 = vpop.permute.xlu0 %638 }
 0x1ff   :  { %v621_v32 = vmax.f32 %v555_v28, 0.0 }
 0x200   :  { %v620_v33 = vmax.f32 %v550_v31, 0.0  ;;  %v876_v34 = vpop.f32.mrb[4].mxu1  ;;  %961 = vmatpush3.bf16.msra.mxu0 %v960_v30 }
 0x201   :  { %v565_v35 = vadd.f32 %v876_v34, %v421_v17  ;;  %v559_v36 = vpop.f32.mrb[5].mxu1  ;;  %962 = vmatprep.subr.bf16.mxu0 %v1071_v11 }
 0x202   :  { %v963_v38 = vpack.c.bf16 %v621_v32, %v620_v33  ;;  %v560_v39 = vadd.f32 %v559_v36, %v416_v18 }
 0x203   :  { %v623_v41 = vmax.f32 %v565_v35, 0.0 }
 0x204   :  { %v622_v42 = vmax.f32 %v560_v39, 0.0  ;;  %v879_v43 = vpop.f32.mrb[6].mxu1  ;;  %964 = vmatpush3.bf16.msra.mxu0 %v963_v38 }
 0x205   :  { %v575_v44 = vadd.f32 %v879_v43, %v431_v24  ;;  %v569_v45 = vpop.f32.mrb[7].mxu1  ;;  %965 = vmatprep.subr.bf16.mxu0 %v1071_v11 }
 0x206   :  { %v966_v46 = vpack.c.bf16 %v623_v41, %v622_v42  ;;  %v570_v47 = vadd.f32 %v569_v45, %v426_v27 }
 0x207   :  { %v625_v48 = vmax.f32 %v575_v44, 0.0 }
 0x208   :  { %v624_v50 = vmax.f32 %v570_v47, 0.0  ;;  %v882_v51 = vpop.f32.mrb[8].mxu1  ;;  %967 = vmatpush3.bf16.msra.mxu0 %v966_v46 }
 0x209   :  { %v585_v53 = vadd.f32 %v882_v51, %v441_v37  ;;  %v579_v54 = vpop.f32.mrb[9].mxu1  ;;  %968 = vmatprep.subr.bf16.mxu0 %v1071_v11 }
 0x20a   :  { %v969_v55 = vpack.c.bf16 %v625_v48, %v624_v50  ;;  %v580_v56 = vadd.f32 %v579_v54, %v436_v40 }
 0x20b   :  { %v627_v57 = vmax.f32 %v585_v53, 0.0 }
 0x20c   :  { %v626_v58 = vmax.f32 %v580_v56, 0.0  ;;  %v885_v59 = vpop.f32.mrb[10].mxu1  ;;  %970 = vmatpush3.bf16.msra.mxu0 %v969_v55 }
 0x20d   :  { %v595_v60 = vadd.f32 %v885_v59, %v451_v49  ;;  %v589_v61 = vpop.f32.mrb[11].mxu1  ;;  %971 = vmatprep.subr.bf16.mxu0 %v1071_v11 }
 0x20e   :  { %v972_v63 = vpack.c.bf16 %v627_v57, %v626_v58  ;;  %v590_v0 = vadd.f32 %v589_v61, %v446_v52 }
 0x20f   :  { %v629_v2 = vmax.f32 %v595_v60, 0.0 }
 0x210   :  { %v628_v3 = vmax.f32 %v590_v0, 0.0  ;;  %v888_v4 = vpop.f32.mrb[12].mxu1  ;;  %973 = vmatpush3.bf16.msra.mxu0 %v972_v63 }
 0x211   :  { %v605_v5 = vadd.f32 %v888_v4, %v461_v62  ;;  %v599_v6 = vpop.f32.mrb[13].mxu1  ;;  %974 = vmatprep.subr.bf16.mxu0 %v1071_v11 }
 0x212   :  { %v975_v7 = vpack.c.bf16 %v629_v2, %v628_v3  ;;  %v600_v8 = vadd.f32 %v599_v6, %v456_v1 }
 0x213   :  { %v631_v9 = vmax.f32 %v605_v5, 0.0 }
 0x214   :  { %v630_v12 = vmax.f32 %v600_v8, 0.0  ;;  %v891_v13 = vpop.f32.mrb[14].mxu1  ;;  %976 = vmatpush3.bf16.msra.mxu0 %v975_v7 }
 0x215   :  { %v615_v15 = vadd.f32 %v891_v13, %v471_v10  ;;  %v609_v16 = vpop.f32.mrb[15].mxu1  ;;  %977 = vmatprep.subr.bf16.mxu0 %v1071_v11 }
 0x216   :  { %v978_v17 = vpack.c.bf16 %v631_v9, %v630_v12  ;;  %v610_v18 = vadd.f32 %v609_v16, %v466_v14 }
 0x217   :  { %v633_v19 = vmax.f32 %v615_v15, 0.0 }
 0x218   :  { %v632_v20 = vmax.f32 %v610_v18, 0.0  ;;  %979 = vmatpush3.bf16.msra.mxu0 %v978_v17 }
 0x219   :  { %980 = vmatprep.subr.bf16.mxu0 %v1071_v11 }
 0x21a   :  { %v981_v21 = vpack.c.bf16 %v633_v19, %v632_v20 }
 0x21c   :  { %982 = vmatpush3.bf16.msra.mxu0 %v981_v21 }
 0x21f   :  { %925 = vmatmul.mubr.f32.vlgmr.msra.gmra.mrb[16].mxu0 %v634_v22 }
 0x2f2   :  { %v707_v24 = vpop.f32.mrb[16].mxu0 }
 0x2f3   :  { %v708_v25 = vadd.f32 %v707_v24, %v639_v23  ;;  %v926_v26 = vpop.f32.mrb[17].mxu0 }
 0x2f5   :  { %711 = vst [vmem:[#allocation7] sm:$0xff] %v708_v25 }
 0x2f6   :  { %1049 = shalt.err (!%p1046_p6)
}
 0x2f7   :  { %s1050_s10 = scalar_lea.hbm %s1159_s2, 128 }
 0x2f8   :  { %p1051_p7 = scmp.ne.s32.totalorder %s1159_s2, %s1050_s10  ;;  %p1054_p8 = scmp.lt.u32.totalorder %s1050_s10, %s1159_s2 }
 0x2fa   :  { %p1056_p9 = pnand %p1054_p8, %p1051_p7 }
 0x2fc   :  { %1059 = shalt.err (!%p1056_p9)
}
 0x2fd   :  { %721 = dma.vmem_to_hbm [thread:$0]  %s719_s6, 128, %s1159_s2, [#allocation4]  }
 0x2fe   :  { %1064 = dma.done.wait [#allocation4], 128  }
 0x2ff   :  { %1065 = vsyncadd [#allocation4], 4294967168 }
 0x300   :  { %725 = vsyncpa [#allocation3], 1 }
 0x301   :  { %726 = vsyncpa [#allocation6], 1 }
 0x302   :  { %727 = vsyncpa [#allocation4], 1 }

</bundles_post_ra>
